<compile_context>
chip_gen: v5e
topology: v5e:2x2
jax: 0.10.0
libtpu: 0.0.40
codegen_flags: <defaults>
</compile_context>

<pallas_src>
import functools

import jax
import jax.numpy as jnp
from jax.experimental import pallas as pl
from jax.experimental.pallas import tpu as pltpu


def _tpu_vmem_and_cores():
    """Best-effort query of (physical VMEM bytes, TensorCores per chip)."""
    vmem_cap = None
    num_cores = None
    try:
        info = pltpu.get_tpu_info()
        vmem_cap = getattr(info, "vmem_capacity_bytes", None)
        for name in ("num_tensorcores", "tensorcores_per_chip",
                     "num_cores", "core_count"):
            val = getattr(info, name, None)
            if isinstance(val, int) and val > 0:
                num_cores = val
                break
    except Exception:
        pass
    if vmem_cap is None:
        vmem_cap = 64 << 20      # conservative: assume v7x-sized VMEM
    if num_cores is None:
        num_cores = 1            # conservative: single TC
    return vmem_cap, num_cores


def _rmsnorm_kernel(x_ref, w_ref, o_ref, *, eps, low_precision_apply):
    # x_ref: (tile_rows, d_model); w_ref: (1, d_model) already in compute dtype.
    x_in = x_ref[...]
    x = x_in.astype(jnp.float32)
    ss = jnp.sum(x * x, axis=-1, keepdims=True)        # per-row sum of squares (XLU)
    inv_rms = jax.lax.rsqrt(ss + eps)                   # EUP rsqrt -> 1/sqrt(sum(x^2)+eps)
    if low_precision_apply:
        # bf16 scale-apply: accumulation stayed f32, write-back pass in bf16.
        o_ref[...] = (x_in * inv_rms.astype(x_in.dtype) * w_ref[...]).astype(o_ref.dtype)
    else:
        o_ref[...] = (x * inv_rms * w_ref[...]).astype(o_ref.dtype)


def rmsnorm(x, weight, eps=1e-6, tile_rows=None, vmem_tile_budget_bytes=None):
    """x: (..., d_model), weight: (d_model,). Matches the PyTorch module."""
    orig_shape = x.shape
    d_model = orig_shape[-1]
    rows = 1
    for s in orig_shape[:-1]:
        rows *= s
    x2 = x.reshape(rows, d_model)

    itemsize = jnp.dtype(x.dtype).itemsize
    low_precision_apply = (x.dtype == jnp.bfloat16)
    # Weight cast once on the host side; the (1, d_model) block stays resident.
    w_dtype = x.dtype if low_precision_apply else jnp.float32
    w2 = weight.reshape(1, d_model).astype(w_dtype)

    vmem_cap, num_cores = _tpu_vmem_and_cores()

    # Generation-aware budgets.
    if vmem_cap >= (96 << 20):       # v5e / v6e: 128 MiB physical VMEM
        default_budget = 72 << 20
        vmem_clamp_hi = 100 << 20
    else:                            # v7x (64 MiB) or unknown: stay conservative
        default_budget = 36 << 20
        vmem_clamp_hi = 56 << 20
    budget = default_budget if vmem_tile_budget_bytes is None else vmem_tile_budget_bytes

    # Sublane packing granularity: 8 rows for f32, 16 for bf16, 32 for 8-bit.
    row_align = max(8, 32 // itemsize)

    # Bytes per row across the pipeline: double-buffered (in + out) tiles plus
    # ~2 f32 tile-rows of in-kernel temporaries (upcast x, products) that are
    # otherwise uncounted for bf16/int8 inputs.
    bytes_per_row = d_model * (4 * itemsize + 2 * 4)
    max_rows = max(row_align, budget // max(bytes_per_row, 1))
    max_rows = max(row_align, (max_rows // row_align) * row_align)

    if tile_rows is None:
        tile_rows = min(1024, max_rows)
    # Re-clamp even caller-supplied tiles to the VMEM-budget-derived max, then
    # to the (aligned) problem size, then snap to the sublane grid.
    tile_rows = min(tile_rows, max_rows)
    tile_rows = min(tile_rows, ((rows + row_align - 1) // row_align) * row_align)
    tile_rows = max(row_align, (tile_rows // row_align) * row_align)

    grid = (pl.cdiv(rows, tile_rows),)

    # Scoped VMEM: pipeline buffers + f32 temporaries + resident weight + headroom.
    vmem_limit = tile_rows * bytes_per_row + 2 * d_model * 4 + (4 << 20)
    vmem_limit = min(max(vmem_limit, 32 << 20), vmem_clamp_hi)

    # On multi-TC chips (v7x) shard the row axis across both TensorCores;
    # elsewhere the plain "parallel" tag (codegen-neutral) is used.
    if num_cores >= 2:
        dim_sem = (pltpu.CORE_PARALLEL,)
    else:
        dim_sem = ("parallel",)

    out = pl.pallas_call(
        functools.partial(_rmsnorm_kernel, eps=eps,
                          low_precision_apply=low_precision_apply),
        out_shape=jax.ShapeDtypeStruct((rows, d_model), x.dtype),
        grid_spec=pltpu.PrefetchScalarGridSpec(
            num_scalar_prefetch=0,
            grid=grid,
            in_specs=[
                pl.BlockSpec((tile_rows, d_model), lambda i: (i, 0)),
                pl.BlockSpec((1, d_model), lambda i: (0, 0)),
            ],
            out_specs=pl.BlockSpec((tile_rows, d_model), lambda i: (i, 0)),
        ),
        compiler_params=pltpu.CompilerParams(
            dimension_semantics=dim_sem,
            vmem_limit_bytes=vmem_limit,
        ),
    )(x2, w2)

    return out.reshape(orig_shape)


def rmsnorm_ref(x, weight, eps=1e-6):
    # Pure-JAX reference mirroring the PyTorch module exactly.
    norm = jnp.linalg.norm(x, ord=2, axis=-1, keepdims=True)
    rms = jnp.sqrt(jnp.mean(norm ** 2, axis=-1, keepdims=True) + eps)
    return weight * x / rms


if __name__ == "__main__":
    key = jax.random.PRNGKey(0)
    batch, seq, d_model = 2, 8, 32

    x = jax.random.normal(key, (batch, seq, d_model), dtype=jnp.float32)
    # Deterministic parameter init matching nn.Parameter(torch.ones(d_model)).
    weight = jnp.ones((d_model,), dtype=jnp.float32)

    out = rmsnorm(x, weight, eps=1e-6)
    out = jax.block_until_ready(out)

    ref = rmsnorm_ref(x, weight, eps=1e-6)
    assert out.shape == x.shape
    assert jnp.allclose(out, ref, atol=1e-5, rtol=1e-5), "mismatch vs reference"

    print("KERNEL_OK")
</pallas_src>

<mosaic_0001>
module attributes {stable_mosaic.version = 11 : i64} {
  func.func @_rmsnorm_kernel(%arg0: i32, %arg1: memref<16x32xf32, #tpu.memory_space<vmem>>, %arg2: memref<1x32xf32, #tpu.memory_space<vmem>>, %arg3: memref<16x32xf32, #tpu.memory_space<vmem>>) attributes {dimension_semantics = [#tpu.dimension_semantics<parallel>], iteration_bounds = array<i64: 1>, scalar_prefetch = 0 : i64, scratch_operands = 0 : i64, tpu.core_type = #tpu.core_type<tc>, window_params = [{transform_indices = @transform_0, window_bounds = array<i64: 16, 32>}, {pipeline_mode = #tpu.pipeline_mode<synchronous>, transform_indices = @transform_1, window_bounds = array<i64: 1, 32>}, {transform_indices = @transform_2, window_bounds = array<i64: 16, 32>}]} {
    %c0 = arith.constant 0 : index
    %c0_0 = arith.constant 0 : index
    %0 = vector.load %arg1[%c0, %c0_0] : memref<16x32xf32, #tpu.memory_space<vmem>>, vector<16x32xf32>
    %1 = arith.mulf %0, %0 : vector<16x32xf32>
    %cst = arith.constant dense<0.000000e+00> : vector<16xf32>
    %2 = vector.multi_reduction <add>, %1, %cst [1] : vector<16x32xf32> to vector<16xf32>
    %3 = vector.shape_cast %2 : vector<16xf32> to vector<16x1xf32>
    %cst_1 = arith.constant 9.99999997E-7 : f32
    %4 = vector.broadcast %cst_1 : f32 to vector<16x1xf32>
    %5 = arith.addf %3, %4 : vector<16x1xf32>
    %6 = math.rsqrt %5 : vector<16x1xf32>
    %7 = vector.broadcast %6 : vector<16x1xf32> to vector<16x32xf32>
    %8 = arith.mulf %0, %7 : vector<16x32xf32>
    %c0_2 = arith.constant 0 : index
    %c0_3 = arith.constant 0 : index
    %9 = vector.load %arg2[%c0_2, %c0_3] : memref<1x32xf32, #tpu.memory_space<vmem>>, vector<1x32xf32>
    %10 = vector.broadcast %9 : vector<1x32xf32> to vector<16x32xf32>
    %11 = arith.mulf %8, %10 : vector<16x32xf32>
    %c0_4 = arith.constant 0 : index
    %c0_5 = arith.constant 0 : index
    %12 = vector.load %arg3[%c0_4, %c0_5] : memref<16x32xf32, #tpu.memory_space<vmem>>, vector<16x32xf32>
    tpu.vector_store %arg3[%c0_4, %c0_5], %11 {strides = array<i32>} : memref<16x32xf32, #tpu.memory_space<vmem>>, vector<16x32xf32>,
    return
  }
  func.func @transform_0(%arg0: i32) -> (i32, i32) {
    %c0_i32 = arith.constant 0 : i32
    %c0_i32_0 = arith.constant 0 : i32
    return %arg0, %c0_i32 : i32, i32
  }
  func.func @transform_1(%arg0: i32) -> (i32, i32) {
    %c0_i32 = arith.constant 0 : i32
    %c0_i32_0 = arith.constant 0 : i32
    %c0_i32_1 = arith.constant 0 : i32
    return %c0_i32, %c0_i32_0 : i32, i32
  }
  func.func @transform_2(%arg0: i32) -> (i32, i32) {
    %c0_i32 = arith.constant 0 : i32
    %c0_i32_0 = arith.constant 0 : i32
    return %arg0, %c0_i32 : i32, i32
  }
}

</mosaic_0001>

<bundles_post_ra>
// kernel: tpu_custom_call.1
= control target key start
LH: loop header
LB: loop body
LE: loop exit
PB: predicated region body
PF: predicated region fallthrough
CT: control target
= control target key end

     0   :  { %7 = vsyncpa [#allocation3], 0  ;;  %s232_s0 = inlined_call_operand.hbm [shape: f32[16,32], index: 0, kind: input, shape index: {}]   ;;  %s233_s1 = inlined_call_operand.hbm [shape: f32[1,32], index: 1, kind: input, shape index: {}]   ;;  %s234_s2 = inlined_call_operand.hbm [shape: f32[16,32], index: 2, kind: output, shape index: {}]  }
   0x1   :  { %8 = vsyncpa [#allocation6], 0 }
   0x2   :  { %9 = vsyncpa [#allocation4], 0  ;;  %s14_s11 = sshll.u32 %s232_s0, 4  ;;  %s193_s12 = smov [#allocation2]   ;;  %s15_s11 = int_to_ptr.hbm [resolvable:$true] %s14_s11 }
   0x3   :  { %s16_s13 = sshll.u32 %s193_s12, 4  ;;  %s28_s16 = sshll.u32 %s233_s1, 4  ;;  %s17_s13 = int_to_ptr.vmem [resolvable:$true] %s16_s13  ;;  %s29_s16 = int_to_ptr.hbm [resolvable:$true] %s28_s16 }
   0x4   :  { %s194_s17 = smov 128   ;;  %s195_s18 = smov 8  }
   0x5   :  { %22 = dma.hbm_to_vmem [thread:$0]  %s15_s11, 256, %s17_s13, [#allocation3], %s194_s17, %s194_s17, %s195_s18  }
   0x6   :  { %s196_s19 = smov [#allocation5]  }
   0x7   :  { %s30_s20 = sshll.u32 %s196_s19, 4  ;;  %s31_s20 = int_to_ptr.vmem [resolvable:$true] %s30_s20 }
   0x8   :  { %33 = dma.hbm_to_vmem [thread:$0]  %s29_s16, 16, %s31_s20, [#allocation6]  }
   0x9   :  { %187 = dma.done.wait [#allocation3], 256  }
   0xa   :  { %188 = vsyncadd [#allocation3], 4294967040 }
   0xb   :  { %189 = dma.done.wait [#allocation6], 16  }
   0xc   :  { %190 = vsyncadd [#allocation6], 4294967280  ;;  %v42_v0 = vld [vmem:[#allocation2] sm:$0xff]  ;;  %vm46_vm0 = vcmask 261120   ;;  %v43_v2 = vld [vmem:[#allocation2 + $0x8] sm:$0xff]  ;;  %s197_s0 = smov [#allocation7]  }
   0xd   :  { %v44_v1 = vmul.f32 %v42_v0, %v42_v0  ;;  %v45_v4 = vmul.f32 %v43_v2, %v43_v2  ;;  %v110_v18 = vld [vmem:[#allocation5] ss:$0 sm:$0xff]  ;;  %s89_s1 = sshll.u32 %s197_s0, 4  ;;  %s91_s23 = sshll.u32 %s234_s2, 4  ;;  %s90_s1 = int_to_ptr.vmem [resolvable:$true] %s89_s1  ;;  %s92_s23 = int_to_ptr.hbm [resolvable:$true] %s91_s23 }
   0xf   :  { %v47_v3 = vsel %vm46_vm0, %v44_v1, 0.0  ;;  %v50_v5 = vsel %vm46_vm0, %v45_v4, 0.0 }
  0x10   :  { %48 = vadd.xlane.f32.xlu0 %v47_v3 }
  0x18   :  { %51 = vadd.xlane.f32.xlu0 %v50_v5 }
  0x83   :  { %v49_v6 = vpop.xlane.xlu0 %48 }
  0x84   :  { %v53_v7 = vadd.f32 1e-06, %v49_v6 }
  0x86   :  { %111 = vrsqrt.f32 %v53_v7  ;;  %vm61_vm2 = vweird.f32 %v53_v7 }
  0x8b   :  { %v52_v8 = vpop.xlane.xlu0 %51 }
  0x8c   :  { %v112_v9 = vpop.eup %111  ;;  %v54_v10 = vadd.f32 1e-06, %v52_v8 }
  0x8d   :  { %v56_v11 = vmul.f32 %v112_v9, %v53_v7  ;;  %vm62_vm1 = vweird.f32 %v112_v9 }
  0x8e   :  { %113 = vrsqrt.f32 %v54_v10  ;;  %vm63_vm3 = vmor %vm61_vm2, %vm62_vm1  ;;  %vm71_vm5 = vweird.f32 %v54_v10 }
  0x8f   :  { %v57_v12 = vmul.f32 %v112_v9, %v56_v11 }
  0x91   :  { %v58_v13 = vmul.f32 0.5, %v57_v12 }
  0x93   :  { %v59_v14 = vsub.f32 1.5, %v58_v13 }
  0x94   :  { %v114_v15 = vpop.eup %113 }
  0x95   :  { %v60_v16 = vmul.f32 %v112_v9, %v59_v14  ;;  %v66_v17 = vmul.f32 %v114_v15, %v54_v10  ;;  %vm72_vm4 = vweird.f32 %v114_v15 }
  0x96   :  { %vm73_vm6 = vmor %vm71_vm5, %vm72_vm4 }
  0x97   :  { %v64_v19 = vsel %vm63_vm3, %v112_v9, %v60_v16  ;;  %v67_v20 = vmul.f32 %v114_v15, %v66_v17 }
  0x98   :  { %v75_v21 = vmul.f32 %v64_v19, %v42_v0 }
  0x99   :  { %v68_v22 = vmul.f32 0.5, %v67_v20 }
  0x9a   :  { %v81_v23 = vmul.f32 %v110_v18, %v75_v21 }
  0x9b   :  { %v69_v24 = vsub.f32 1.5, %v68_v22 }
  0x9c   :  { %83 = vst.msk [vmem:[#allocation7] sm:$0xff] %vm46_vm0, %v81_v23 }
  0x9d   :  { %v70_v25 = vmul.f32 %v114_v15, %v69_v24 }
  0x9f   :  { %v74_v26 = vsel %vm73_vm6, %v114_v15, %v70_v25 }
  0xa0   :  { %v76_v27 = vmul.f32 %v74_v26, %v43_v2 }
  0xa2   :  { %v82_v28 = vmul.f32 %v110_v18, %v76_v27 }
  0xa4   :  { %84 = vst.msk [vmem:[#allocation7 + $0x8] sm:$0xff] %vm46_vm0, %v82_v28 }
  0xa5   :  { %97 = dma.vmem_to_hbm [thread:$0]  %s90_s1, 256, %s92_s23, [#allocation4], %s194_s17, %s194_s17, %s195_s18  }
  0xa6   :  { %191 = dma.done.wait [#allocation4], 256  }
  0xa7   :  { %192 = vsyncadd [#allocation4], 4294967040 }
  0xa8   :  { %102 = vsyncpa [#allocation3], 1 }
  0xa9   :  { %103 = vsyncpa [#allocation6], 1 }
  0xaa   :  { %104 = vsyncpa [#allocation4], 1 }

</bundles_post_ra>
